<compile_context>
chip_gen: v7x
topology: tpu7x:2x2x1
jax: 0.10.0
libtpu: 0.0.40
codegen_flags: <defaults>
</compile_context>

<pallas_src>
import math
import functools

import jax
import jax.numpy as jnp
from jax.experimental import pallas as pl
from jax.experimental.pallas import tpu as pltpu


# ----------------------------- configuration -------------------------------
EMB_DIM = 32
NUM_WORDS = 8
REPR_DIM = 128          # = C * H * W of the example input
HIDDEN_DIM = 128
NUM_LAYERS = 4
OUT_DIM = EMB_DIM * NUM_WORDS   # 256

BATCH_TILE = 2048       # max rows per grid step (fits comfortably in VMEM)
MIN_MULTI_TILE = 64     # batches >= this always get >= 2 grid steps (v7x TCs)


def _round_up(x, m):
    return ((x + m - 1) // m) * m


# ------------------------------- kernel ------------------------------------
def mlp_encoder_kernel(z_ref,
                       w1_ref, b1_ref,
                       w2_ref, b2_ref,
                       w3_ref, b3_ref,
                       w4_ref, b4_ref,
                       o_ref):
    """Fused 4-layer MLP: (Linear + ReLU) x 3 -> Linear.

    z_ref : (tile, REPR_DIM)  f32   (cast to bf16 in-register before each dot)
    wK    : (in_dim, out_dim) bf16  (grid-invariant VMEM resident)
    bK    : (1, out_dim)      f32
    o_ref : (tile, OUT_DIM)   bf16  (f32 accumulate inside, cast on store)
    """
    def layer(h, w_ref, b_ref, relu):
        # Cast matmul inputs to the weight dtype (bf16) so the MXU runs its
        # native path; accumulate in f32; bias add / ReLU stay in f32 (VPU).
        h = jnp.dot(h.astype(w_ref.dtype), w_ref[...],
                    preferred_element_type=jnp.float32) + b_ref[...]
        if relu:
            h = jnp.maximum(h, 0.0)
        return h

    h = z_ref[...]
    h = layer(h, w1_ref, b1_ref, True)
    h = layer(h, w2_ref, b2_ref, True)
    h = layer(h, w3_ref, b3_ref, True)
    h = layer(h, w4_ref, b4_ref, False)
    o_ref[...] = h.astype(o_ref.dtype)


# ------------------------------- wrapper ------------------------------------
@functools.partial(jax.jit,
                   static_argnames=("num_words", "emb_dim", "out_dtype"))
def mlp_embedding_encoder(z, params, *, num_words=NUM_WORDS, emb_dim=EMB_DIM,
                          out_dtype=jnp.bfloat16):
    """Equivalent of EmbeddingEncoder.forward (MLP variant).

    z: (bs, ...) float32, params: 4 x (bf16 weight (in,out), f32 bias (1,out))
    -> (bs, num_words, emb_dim) in `out_dtype`.
    """
    bs = z.shape[0]
    z2d = z.reshape(bs, -1)                      # z.view(bs, -1)
    repr_dim = z2d.shape[1]
    out_dim = num_words * emb_dim

    # Tiling:
    #  * pad the batch only to a multiple of 8 (sublane granularity),
    #  * tiny batches (< 64 rows): one grid step,
    #  * medium batches: exactly 2 grid steps (v7x megacore + DMA/compute
    #    pipelining on all generations),
    #  * large batches: BATCH_TILE-row tiles, partial last block masked.
    padded_bs = max(8, _round_up(bs, 8))
    if padded_bs < MIN_MULTI_TILE:
        batch_tile = padded_bs
    elif padded_bs <= 2 * BATCH_TILE:
        batch_tile = _round_up(pl.cdiv(padded_bs, 2), 8)
    else:
        batch_tile = BATCH_TILE
    grid = (pl.cdiv(padded_bs, batch_tile),)

    if padded_bs != bs:
        z2d = jnp.pad(z2d, ((0, padded_bs - bs), (0, 0)))
    # NOTE: z2d deliberately stays f32 here; the bf16 cast happens in-register
    # inside the kernel, avoiding a separate XLA pass over z.

    (w1, b1), (w2, b2), (w3, b3), (w4, b4) = params
    weights = (w1, w2, w3, w4)
    biases = (b1, b2, b3, b4)

    # Constant index maps => grid-invariant VMEM residents (DMA'd once).
    full = lambda shape: pl.BlockSpec(shape, lambda i: (0, 0))

    # Advisory cost estimate for the XLA scheduler.
    flops = sum(2 * padded_bs * w.shape[0] * w.shape[1] for w in weights)
    bytes_accessed = (
        z2d.size * z2d.dtype.itemsize
        + sum(w.size * w.dtype.itemsize for w in weights)
        + sum(b.size * b.dtype.itemsize for b in biases)
        + padded_bs * out_dim * jnp.dtype(out_dtype).itemsize)
    cost = pl.CostEstimate(flops=flops, transcendentals=0,
                           bytes_accessed=bytes_accessed)

    out = pl.pallas_call(
        mlp_encoder_kernel,
        out_shape=jax.ShapeDtypeStruct((padded_bs, out_dim), out_dtype),
        grid_spec=pltpu.PrefetchScalarGridSpec(
            num_scalar_prefetch=0,
            grid=grid,
            in_specs=[
                pl.BlockSpec((batch_tile, repr_dim), lambda i: (i, 0)),  # z
                full(w1.shape), full(b1.shape),
                full(w2.shape), full(b2.shape),
                full(w3.shape), full(b3.shape),
                full(w4.shape), full(b4.shape),
            ],
            out_specs=pl.BlockSpec((batch_tile, out_dim), lambda i: (i, 0)),
        ),
        compiler_params=pltpu.CompilerParams(
            dimension_semantics=("parallel",),
            vmem_limit_bytes=32 << 20),
        cost_estimate=cost,
    )(z2d, w1, b1, w2, b2, w3, b3, w4, b4)

    out = out[:bs]
    return out.reshape(bs, num_words, emb_dim)


# --------------------------- parameter init ---------------------------------
def init_linear(key, fan_in, fan_out):
    """Deterministic PyTorch-style nn.Linear init (kaiming-uniform-ish)."""
    kw, kb = jax.random.split(key)
    bound = 1.0 / math.sqrt(fan_in)
    # stored as (in, out) so the kernel does x @ W  (== x @ W_torch.T)
    w = jax.random.uniform(kw, (fan_in, fan_out), jnp.float32, -bound, bound)
    b = jax.random.uniform(kb, (1, fan_out), jnp.float32, -bound, bound)
    return w, b


def init_params(key):
    dims = [REPR_DIM] + [HIDDEN_DIM] * (NUM_LAYERS - 1) + [OUT_DIM]
    keys = jax.random.split(key, NUM_LAYERS)
    return tuple(init_linear(k, dims[i], dims[i + 1])
                 for i, k in enumerate(keys))


def cast_params_for_kernel(params_f32):
    """One-time cast of weights to bf16 (MXU-native); biases stay f32."""
    return tuple((w.astype(jnp.bfloat16), b.astype(jnp.float32))
                 for (w, b) in params_f32)


# ----------------------------- reference ------------------------------------
def reference_forward(z, params_f32):
    """Pure-JAX reference mirroring the kernel numerics (bf16 matmul inputs,
    f32 accumulate / bias / ReLU), result kept in f32."""
    bs = z.shape[0]
    h = z.reshape(bs, -1)
    n = len(params_f32)
    for li, (w, b) in enumerate(params_f32):
        h = jnp.dot(h.astype(jnp.bfloat16), w.astype(jnp.bfloat16),
                    preferred_element_type=jnp.float32) + b
        if li < n - 1:
            h = jnp.maximum(h, 0.0)
    return h.reshape(bs, NUM_WORDS, EMB_DIM)


# -------------------------------- main ---------------------------------------
if __name__ == "__main__":
    key = jax.random.PRNGKey(0)
    k_z, k_z2, k_p = jax.random.split(key, 3)

    params_f32 = init_params(k_p)
    params = cast_params_for_kernel(params_f32)   # outside the per-call path

    # bf16 output + bf16 matmul inputs compound a little rounding over 4
    # layers; tolerance sized accordingly (errors from wrong math are O(1)).
    tol = 3e-2

    # small example input: (bs, C, H, W) = (2, 2, 8, 8) -> repr_dim = 128
    # (exercises the tiny single-grid-step path)
    z = jax.random.normal(k_z, (2, 2, 8, 8), jnp.float32)
    out = jax.block_until_ready(mlp_embedding_encoder(z, params))
    ref = reference_forward(z, params_f32)
    assert out.shape == (2, NUM_WORDS, EMB_DIM), out.shape
    assert out.dtype == jnp.bfloat16, out.dtype
    assert jnp.allclose(out.astype(jnp.float32), ref, atol=tol, rtol=tol), \
        float(jnp.max(jnp.abs(out.astype(jnp.float32) - ref)))

    # larger batch exercising the two-grid-step path (1100 -> pad 1104 ->
    # 2 tiles of 552 rows; both TensorCores engaged on v7x)
    z_big = jax.random.normal(k_z2, (1100, 2, 8, 8), jnp.float32)
    out_big = jax.block_until_ready(mlp_embedding_encoder(z_big, params))
    ref_big = reference_forward(z_big, params_f32)
    assert out_big.shape == (1100, NUM_WORDS, EMB_DIM), out_big.shape
    assert jnp.allclose(out_big.astype(jnp.float32), ref_big,
                        atol=tol, rtol=tol), \
        float(jnp.max(jnp.abs(out_big.astype(jnp.float32) - ref_big)))

    print("KERNEL_OK")
</pallas_src>

<mosaic_0001>
module attributes {stable_mosaic.version = 11 : i64} {
  func.func @mlp_encoder_kernel(%arg0: i32, %arg1: memref<8x128xf32, #tpu.memory_space<vmem>>, %arg2: memref<128x128xbf16, #tpu.memory_space<vmem>>, %arg3: memref<1x128xf32, #tpu.memory_space<vmem>>, %arg4: memref<128x128xbf16, #tpu.memory_space<vmem>>, %arg5: memref<1x128xf32, #tpu.memory_space<vmem>>, %arg6: memref<128x128xbf16, #tpu.memory_space<vmem>>, %arg7: memref<1x128xf32, #tpu.memory_space<vmem>>, %arg8: memref<128x256xbf16, #tpu.memory_space<vmem>>, %arg9: memref<1x256xf32, #tpu.memory_space<vmem>>, %arg10: memref<8x256xbf16, #tpu.memory_space<vmem>>) attributes {dimension_semantics = [#tpu.dimension_semantics<parallel>], iteration_bounds = array<i64: 1>, scalar_prefetch = 0 : i64, scratch_operands = 0 : i64, tpu.core_type = #tpu.core_type<tc>, window_params = [{transform_indices = @transform_0, window_bounds = array<i64: 8, 128>}, {pipeline_mode = #tpu.pipeline_mode<synchronous>, transform_indices = @transform_1, window_bounds = array<i64: 128, 128>}, {pipeline_mode = #tpu.pipeline_mode<synchronous>, transform_indices = @transform_2, window_bounds = array<i64: 1, 128>}, {pipeline_mode = #tpu.pipeline_mode<synchronous>, transform_indices = @transform_3, window_bounds = array<i64: 128, 128>}, {pipeline_mode = #tpu.pipeline_mode<synchronous>, transform_indices = @transform_4, window_bounds = array<i64: 1, 128>}, {pipeline_mode = #tpu.pipeline_mode<synchronous>, transform_indices = @transform_5, window_bounds = array<i64: 128, 128>}, {pipeline_mode = #tpu.pipeline_mode<synchronous>, transform_indices = @transform_6, window_bounds = array<i64: 1, 128>}, {pipeline_mode = #tpu.pipeline_mode<synchronous>, transform_indices = @transform_7, window_bounds = array<i64: 128, 256>}, {pipeline_mode = #tpu.pipeline_mode<synchronous>, transform_indices = @transform_8, window_bounds = array<i64: 1, 256>}, {transform_indices = @transform_9, window_bounds = array<i64: 8, 256>}]} {
    %c0 = arith.constant 0 : index
    %c0_0 = arith.constant 0 : index
    %0 = vector.load %arg1[%c0, %c0_0] : memref<8x128xf32, #tpu.memory_space<vmem>>, vector<8x128xf32>
    %1 = arith.truncf %0 : vector<8x128xf32> to vector<8x128xbf16>
    %c0_1 = arith.constant 0 : index
    %c0_2 = arith.constant 0 : index
    %2 = vector.load %arg2[%c0_1, %c0_2] : memref<128x128xbf16, #tpu.memory_space<vmem>>, vector<128x128xbf16>
    %cst = arith.constant dense<0.000000e+00> : vector<8x128xf32>
    %3 = tpu.matmul %1, %2, %cst {dimension_numbers = #tpu.dot_dimension_numbers<[1], [0], [0], [1], [0, 0, 1, 1], [], []>} : vector<8x128xbf16>, vector<128x128xbf16>, vector<8x128xf32> -> vector<8x128xf32>
    %c0_3 = arith.constant 0 : index
    %c0_4 = arith.constant 0 : index
    %4 = vector.load %arg3[%c0_3, %c0_4] : memref<1x128xf32, #tpu.memory_space<vmem>>, vector<1x128xf32>
    %5 = vector.broadcast %4 : vector<1x128xf32> to vector<8x128xf32>
    %6 = arith.addf %3, %5 : vector<8x128xf32>
    %cst_5 = arith.constant 0.000000e+00 : f32
    %7 = vector.broadcast %cst_5 : f32 to vector<8x128xf32>
    %8 = arith.maximumf %6, %7 : vector<8x128xf32>
    %9 = arith.truncf %8 : vector<8x128xf32> to vector<8x128xbf16>
    %c0_6 = arith.constant 0 : index
    %c0_7 = arith.constant 0 : index
    %10 = vector.load %arg4[%c0_6, %c0_7] : memref<128x128xbf16, #tpu.memory_space<vmem>>, vector<128x128xbf16>
    %cst_8 = arith.constant dense<0.000000e+00> : vector<8x128xf32>
    %11 = tpu.matmul %9, %10, %cst_8 {dimension_numbers = #tpu.dot_dimension_numbers<[1], [0], [0], [1], [0, 0, 1, 1], [], []>} : vector<8x128xbf16>, vector<128x128xbf16>, vector<8x128xf32> -> vector<8x128xf32>
    %c0_9 = arith.constant 0 : index
    %c0_10 = arith.constant 0 : index
    %12 = vector.load %arg5[%c0_9, %c0_10] : memref<1x128xf32, #tpu.memory_space<vmem>>, vector<1x128xf32>
    %13 = vector.broadcast %12 : vector<1x128xf32> to vector<8x128xf32>
    %14 = arith.addf %11, %13 : vector<8x128xf32>
    %cst_11 = arith.constant 0.000000e+00 : f32
    %15 = vector.broadcast %cst_11 : f32 to vector<8x128xf32>
    %16 = arith.maximumf %14, %15 : vector<8x128xf32>
    %17 = arith.truncf %16 : vector<8x128xf32> to vector<8x128xbf16>
    %c0_12 = arith.constant 0 : index
    %c0_13 = arith.constant 0 : index
    %18 = vector.load %arg6[%c0_12, %c0_13] : memref<128x128xbf16, #tpu.memory_space<vmem>>, vector<128x128xbf16>
    %cst_14 = arith.constant dense<0.000000e+00> : vector<8x128xf32>
    %19 = tpu.matmul %17, %18, %cst_14 {dimension_numbers = #tpu.dot_dimension_numbers<[1], [0], [0], [1], [0, 0, 1, 1], [], []>} : vector<8x128xbf16>, vector<128x128xbf16>, vector<8x128xf32> -> vector<8x128xf32>
    %c0_15 = arith.constant 0 : index
    %c0_16 = arith.constant 0 : index
    %20 = vector.load %arg7[%c0_15, %c0_16] : memref<1x128xf32, #tpu.memory_space<vmem>>, vector<1x128xf32>
    %21 = vector.broadcast %20 : vector<1x128xf32> to vector<8x128xf32>
    %22 = arith.addf %19, %21 : vector<8x128xf32>
    %cst_17 = arith.constant 0.000000e+00 : f32
    %23 = vector.broadcast %cst_17 : f32 to vector<8x128xf32>
    %24 = arith.maximumf %22, %23 : vector<8x128xf32>
    %25 = arith.truncf %24 : vector<8x128xf32> to vector<8x128xbf16>
    %c0_18 = arith.constant 0 : index
    %c0_19 = arith.constant 0 : index
    %26 = vector.load %arg8[%c0_18, %c0_19] : memref<128x256xbf16, #tpu.memory_space<vmem>>, vector<128x256xbf16>
    %cst_20 = arith.constant dense<0.000000e+00> : vector<8x256xf32>
    %27 = tpu.matmul %25, %26, %cst_20 {dimension_numbers = #tpu.dot_dimension_numbers<[1], [0], [0], [1], [0, 0, 1, 1], [], []>} : vector<8x128xbf16>, vector<128x256xbf16>, vector<8x256xf32> -> vector<8x256xf32>
    %c0_21 = arith.constant 0 : index
    %c0_22 = arith.constant 0 : index
    %28 = vector.load %arg9[%c0_21, %c0_22] : memref<1x256xf32, #tpu.memory_space<vmem>>, vector<1x256xf32>
    %29 = vector.broadcast %28 : vector<1x256xf32> to vector<8x256xf32>
    %30 = arith.addf %27, %29 : vector<8x256xf32>
    %31 = arith.truncf %30 : vector<8x256xf32> to vector<8x256xbf16>
    %c0_23 = arith.constant 0 : index
    %c0_24 = arith.constant 0 : index
    %32 = vector.load %arg10[%c0_23, %c0_24] : memref<8x256xbf16, #tpu.memory_space<vmem>>, vector<8x256xbf16>
    tpu.vector_store %arg10[%c0_23, %c0_24], %31 {strides = array<i32>} : memref<8x256xbf16, #tpu.memory_space<vmem>>, vector<8x256xbf16>,
    return
  }
  func.func @transform_0(%arg0: i32) -> (i32, i32) {
    %c0_i32 = arith.constant 0 : i32
    %c0_i32_0 = arith.constant 0 : i32
    return %arg0, %c0_i32 : i32, i32
  }
  func.func @transform_1(%arg0: i32) -> (i32, i32) {
    %c0_i32 = arith.constant 0 : i32
    %c0_i32_0 = arith.constant 0 : i32
    %c0_i32_1 = arith.constant 0 : i32
    return %c0_i32, %c0_i32_0 : i32, i32
  }
  func.func @transform_2(%arg0: i32) -> (i32, i32) {
    %c0_i32 = arith.constant 0 : i32
    %c0_i32_0 = arith.constant 0 : i32
    %c0_i32_1 = arith.constant 0 : i32
    return %c0_i32, %c0_i32_0 : i32, i32
  }
  func.func @transform_3(%arg0: i32) -> (i32, i32) {
    %c0_i32 = arith.constant 0 : i32
    %c0_i32_0 = arith.constant 0 : i32
    %c0_i32_1 = arith.constant 0 : i32
    return %c0_i32, %c0_i32_0 : i32, i32
  }
  func.func @transform_4(%arg0: i32) -> (i32, i32) {
    %c0_i32 = arith.constant 0 : i32
    %c0_i32_0 = arith.constant 0 : i32
    %c0_i32_1 = arith.constant 0 : i32
    return %c0_i32, %c0_i32_0 : i32, i32
  }
  func.func @transform_5(%arg0: i32) -> (i32, i32) {
    %c0_i32 = arith.constant 0 : i32
    %c0_i32_0 = arith.constant 0 : i32
    %c0_i32_1 = arith.constant 0 : i32
    return %c0_i32, %c0_i32_0 : i32, i32
  }
  func.func @transform_6(%arg0: i32) -> (i32, i32) {
    %c0_i32 = arith.constant 0 : i32
    %c0_i32_0 = arith.constant 0 : i32
    %c0_i32_1 = arith.constant 0 : i32
    return %c0_i32, %c0_i32_0 : i32, i32
  }
  func.func @transform_7(%arg0: i32) -> (i32, i32) {
    %c0_i32 = arith.constant 0 : i32
    %c0_i32_0 = arith.constant 0 : i32
    %c0_i32_1 = arith.constant 0 : i32
    return %c0_i32, %c0_i32_0 : i32, i32
  }
  func.func @transform_8(%arg0: i32) -> (i32, i32) {
    %c0_i32 = arith.constant 0 : i32
    %c0_i32_0 = arith.constant 0 : i32
    %c0_i32_1 = arith.constant 0 : i32
    return %c0_i32, %c0_i32_0 : i32, i32
  }
  func.func @transform_9(%arg0: i32) -> (i32, i32) {
    %c0_i32 = arith.constant 0 : i32
    %c0_i32_0 = arith.constant 0 : i32
    return %arg0, %c0_i32 : i32, i32
  }
}

</mosaic_0001>

<bundles_post_ra>
// kernel: mlp_embedding_encoder.1
= control target key start
LH: loop header
LB: loop body
LE: loop exit
PB: predicated region body
PF: predicated region fallthrough
CT: control target
= control target key end

     0   :  { %14 = vsyncpa [#allocation3], 0  ;;  %s1059_s0 = inlined_call_operand.vmem [shape: f32[8,128], index: 0, kind: input, shape index: {}]   ;;  %s1060_s1 = inlined_call_operand.hbm [shape: bf16[128,128], index: 1, kind: input, shape index: {}]   ;;  %s1061_s2 = inlined_call_operand.vmem [shape: f32[1,128], index: 2, kind: input, shape index: {}]   ;;  %s1062_s3 = inlined_call_operand.hbm [shape: bf16[128,128], index: 3, kind: input, shape index: {}]   ;;  %s1063_s4 = inlined_call_operand.vmem [shape: f32[1,128], index: 4, kind: input, shape index: {}]   ;;  %s1064_s5 = inlined_call_operand.hbm [shape: bf16[128,128], index: 5, kind: input, shape index: {}]   ;;  %s1065_s6 = inlined_call_operand.vmem [shape: f32[1,128], index: 6, kind: input, shape index: {}]   ;;  %s1066_s7 = inlined_call_operand.hbm [shape: bf16[128,256], index: 7, kind: input, shape index: {}]   ;;  %s1067_s8 = inlined_call_operand.vmem [shape: f32[1,256], index: 8, kind: input, shape index: {}]   ;;  %s1068_s9 = inlined_call_operand.vmem [shape: bf16[8,256], index: 9, kind: output, shape index: {}]  }
   0x1   :  { %15 = vsyncpa [#allocation5], 0 }
   0x2   :  { %16 = vsyncpa [#allocation8], 0  ;;  %s879_s30 = smov [#allocation4]   ;;  %s880_s11 = smov [#allocation2]  }
   0x3   :  { %s38_s10 = sshll.u32 %s879_s30, 4  ;;  %s24_s12 = sshll.u32 %s880_s11, 4  ;;  %s39_s10 = int_to_ptr.vmem [resolvable:$true] %s38_s10  ;;  %s940_s12 = int_to_ptr.vmem [resolvable:$true] %s24_s12 }
   0x4   :  { %s785_s15 = scalar_lea.hbm %s1062_s3, 1024 }
   0x5   :  { %p786_p0 = scmp.ne.s32.totalorder %s1062_s3, %s785_s15  ;;  %p789_p1 = scmp.lt.u32.totalorder %s785_s15, %s1062_s3 }
   0x7   :  { %p791_p2 = pnand %p789_p1, %p786_p0 }
   0x9   :  { %794 = shalt.err (!%p791_p2)
}
   0xa   :  { %s795_s20 = scalar_lea.vmem %s39_s10, 1024  ;;  %p800_p4 = scmp.lt.s32.totalorder %s39_s10, %s39_s10 }
   0xb   :  { %p796_p3 = scmp.ne.s32.totalorder %s39_s10, %s795_s20  ;;  %p801_p5 = scmp.lt.s32.totalorder %s795_s20, %s795_s20 }
   0xd   :  { %p802_p6 = por %p801_p5, %p800_p4 }
   0xf   :  { %p803_p7 = pnand %p802_p6, %p796_p3 }
  0x11   :  { %806 = shalt.err (!%p803_p7)
}
  0x12   :  { %s881_s21 = smov 64   ;;  %s882_s22 = smov 4  }
  0x13   :  { %44 = dma.hbm_to_vmem [thread:$0]  %s1062_s3, 1024, %s39_s10, [#allocation5], %s881_s21, %s881_s21, %s882_s22  }
  0x14   :  { %s807_s27 = scalar_lea.hbm %s1060_s1, 1024 }
  0x15   :  { %p808_p8 = scmp.ne.s32.totalorder %s1060_s1, %s807_s27  ;;  %p811_p9 = scmp.lt.u32.totalorder %s807_s27, %s1060_s1 }
  0x17   :  { %p813_p10 = pnand %p811_p9, %p808_p8 }
  0x19   :  { %816 = shalt.err (!%p813_p10)
}
  0x1a   :  { %s817_s13 = scalar_lea.vmem %s940_s12, 1024  ;;  %p822_p12 = scmp.lt.s32.totalorder %s940_s12, %s940_s12 }
  0x1b   :  { %p818_p11 = scmp.ne.s32.totalorder %s940_s12, %s817_s13  ;;  %p823_p13 = scmp.lt.s32.totalorder %s817_s13, %s817_s13 }
  0x1d   :  { %p824_p0 = por %p823_p13, %p822_p12 }
  0x1f   :  { %p825_p1 = pnand %p824_p0, %p818_p11 }
  0x21   :  { %828 = shalt.err (!%p825_p1)
}
  0x22   :  { %30 = dma.hbm_to_vmem [thread:$0]  %s1060_s1, 1024, %s940_s12, [#allocation3], %s881_s21, %s881_s21, %s882_s22  }
  0x23   :  { %s883_s14 = smov [#allocation6]   ;;  %s884_s16 = smov [#allocation7]  }
  0x24   :  { %s52_s15 = sshll.u32 %s883_s14, 4  ;;  %s66_s17 = sshll.u32 %s884_s16, 4  ;;  %s53_s15 = int_to_ptr.vmem [resolvable:$true] %s52_s15  ;;  %s977_s17 = int_to_ptr.vmem [resolvable:$true] %s66_s17 }
  0x25   :  { %s829_s20 = scalar_lea.hbm %s1064_s5, 1024 }
  0x26   :  { %p830_p2 = scmp.ne.s32.totalorder %s1064_s5, %s829_s20  ;;  %p833_p3 = scmp.lt.u32.totalorder %s829_s20, %s1064_s5 }
  0x28   :  { %p835_p4 = pnand %p833_p3, %p830_p2 }
  0x2a   :  { %838 = shalt.err (!%p835_p4)
}
  0x2b   :  { %s839_s1 = scalar_lea.vmem %s53_s15, 1024  ;;  %p844_p6 = scmp.lt.s32.totalorder %s53_s15, %s53_s15 }
  0x2c   :  { %p840_p5 = scmp.ne.s32.totalorder %s53_s15, %s839_s1  ;;  %p845_p7 = scmp.lt.s32.totalorder %s839_s1, %s839_s1 }
  0x2e   :  { %p846_p8 = por %p845_p7, %p844_p6 }
  0x30   :  { %p847_p9 = pnand %p846_p8, %p840_p5 }
  0x32   :  { %850 = shalt.err (!%p847_p9)
}
  0x33   :  { %58 = dma.hbm_to_vmem [thread:$0]  %s1064_s5, 1024, %s53_s15, [#allocation5], %s881_s21, %s881_s21, %s882_s22  }
  0x34   :  { %s851_s30 = scalar_lea.hbm %s1066_s7, 2048 }
  0x35   :  { %p852_p10 = scmp.ne.s32.totalorder %s1066_s7, %s851_s30  ;;  %p855_p11 = scmp.lt.u32.totalorder %s851_s30, %s1066_s7 }
  0x37   :  { %p857_p12 = pnand %p855_p11, %p852_p10 }
  0x39   :  { %860 = shalt.err (!%p857_p12)
}
  0x3a   :  { %s861_s14 = scalar_lea.vmem %s977_s17, 2048  ;;  %p866_p0 = scmp.lt.s32.totalorder %s977_s17, %s977_s17 }
  0x3b   :  { %p862_p13 = scmp.ne.s32.totalorder %s977_s17, %s861_s14  ;;  %p867_p1 = scmp.lt.s32.totalorder %s861_s14, %s861_s14 }
  0x3d   :  { %p868_p2 = por %p867_p1, %p866_p0 }
  0x3f   :  { %p869_p3 = pnand %p868_p2, %p862_p13 }
  0x41   :  { %872 = shalt.err (!%p869_p3)
}
  0x42   :  { %s885_s5 = smov 128   ;;  %s886_s21 = smov 8  }
  0x43   :  { %72 = dma.hbm_to_vmem [thread:$0]  %s1066_s7, 2048, %s977_s17, [#allocation8], %s885_s5, %s885_s5, %s886_s21  }
  0x44   :  { %873 = dma.done.wait [#allocation3], 1024  }
  0x45   :  { %874 = vsyncadd [#allocation3], 4294966272 }
  0x46   :  { %875 = dma.done.wait [#allocation5], 2048  }
  0x47   :  { %876 = vsyncadd [#allocation5], 4294965248 }
  0x48   :  { %877 = dma.done.wait [#allocation8], 2048  }
  0x49   :  { %878 = vsyncadd [#allocation8], 4294965248  ;;  %v887_v0 = vmov 0.0   ;;  %vm888_vm0 = vmmov 0   ;;  %v737_v1 = vld [vmem:[#allocation2] sm:$0xff]   ;;  %v738_v2 = vld [vmem:[#allocation2 + $0x8] sm:$0xff]  }
  0x4a   :  { %666 = vmatprep.subr.bf16.mxu0 %v887_v0  ;;  %682 = vmatprep.mubr.msk.bf16.mxu0 %vm888_vm0, %v887_v0  ;;  %v739_v3 = vld [vmem:[#allocation2 + $0x10] sm:$0xff]   ;;  %v745_v4 = vld [vmem:[#allocation4] sm:$0xff]   ;;  %v740_v5 = vld [vmem:[#allocation2 + $0x18] sm:$0xff]   ;;  %v889_v59 = vmov 0  }
  0x4b   :  { %686 = vmatprep.subr.bf16.mxu1 %v887_v0  ;;  %702 = vmatprep.mubr.msk.bf16.mxu1 %vm888_vm0, %v887_v0  ;;  %v746_v6 = vld [vmem:[#allocation4 + $0x8] sm:$0xff]   ;;  %v741_v7 = vld [vmem:[#allocation2 + $0x20] sm:$0xff]   ;;  %v747_v8 = vld [vmem:[#allocation4 + $0x10] sm:$0xff]  }
  0x4c   :  { %667 = vmatpush3.bf16.msra.mxu0 %v737_v1  ;;  %687 = vmatpush3.bf16.msra.mxu1 %v745_v4  ;;  %v742_v9 = vld [vmem:[#allocation2 + $0x28] sm:$0xff]   ;;  %v748_v10 = vld [vmem:[#allocation4 + $0x18] sm:$0xff]   ;;  %v743_v11 = vld [vmem:[#allocation2 + $0x30] sm:$0xff]   ;;  %v447_v4 = vlaneseq }
  0x4d   :  { %668 = vmatprep.subr.bf16.mxu0 %v887_v0  ;;  %688 = vmatprep.subr.bf16.mxu1 %v887_v0  ;;  %v749_v12 = vld [vmem:[#allocation4 + $0x20] sm:$0xff]   ;;  %v744_v13 = vld [vmem:[#allocation2 + $0x38] sm:$0xff]   ;;  %v750_v15 = vld [vmem:[#allocation4 + $0x28] sm:$0xff]  }
  0x4e   :  { %v88_v14 = vld [vmem:[%s1059_s0] sm:$0xff]  ;;  %v751_v17 = vld [vmem:[#allocation4 + $0x30] sm:$0xff]   ;;  %v752_v18 = vld [vmem:[#allocation4 + $0x38] sm:$0xff]  }
  0x4f   :  { %v89_v16 = vpack.c.bf16 %v88_v14, %v88_v14  ;;  %v753_v19 = vld [vmem:[#allocation6] sm:$0xff]   ;;  %v754_v20 = vld [vmem:[#allocation6 + $0x8] sm:$0xff]   ;;  %v755_v21 = vld [vmem:[#allocation6 + $0x10] sm:$0xff]  }
  0x50   :  { %669 = vmatpush3.bf16.msra.mxu0 %v738_v2  ;;  %689 = vmatpush3.bf16.msra.mxu1 %v746_v6  ;;  %v756_v22 = vld [vmem:[#allocation6 + $0x18] sm:$0xff]   ;;  %v757_v23 = vld [vmem:[#allocation6 + $0x20] sm:$0xff]   ;;  %v758_v24 = vld [vmem:[#allocation6 + $0x28] sm:$0xff]  }
  0x51   :  { %670 = vmatprep.subr.bf16.mxu0 %v887_v0  ;;  %690 = vmatprep.subr.bf16.mxu1 %v887_v0  ;;  %v594_v25 = vld [vmem:[%s1061_s2] ss:$0 sm:$0xff]  ;;  %v759_v33 = vld [vmem:[#allocation6 + $0x30] sm:$0xff]   ;;  %v760_v34 = vld [vmem:[#allocation6 + $0x38] sm:$0xff]  }
  0x52   :  { %v761_v35 = vld [vmem:[#allocation7] ss:$8 sps:$4 sm:$0xff]   ;;  %v763_v36 = vld [vmem:[#allocation7 + $0x4] ss:$8 sps:$4 sm:$0xff]   ;;  %v766_v37 = vld [vmem:[#allocation7 + $0x14] ss:$8 sps:$4 sm:$0xff]  }
  0x53   :  { %v764_v38 = vld [vmem:[#allocation7 + $0x10] ss:$8 sps:$4 sm:$0xff]   ;;  %v769_v39 = vld [vmem:[#allocation7 + $0x24] ss:$8 sps:$4 sm:$0xff]   ;;  %v767_v40 = vld [vmem:[#allocation7 + $0x20] ss:$8 sps:$4 sm:$0xff]  }
  0x54   :  { %671 = vmatpush3.bf16.msra.mxu0 %v739_v3  ;;  %691 = vmatpush3.bf16.msra.mxu1 %v747_v8  ;;  %v772_v41 = vld [vmem:[#allocation7 + $0x34] ss:$8 sps:$4 sm:$0xff]   ;;  %v770_v42 = vld [vmem:[#allocation7 + $0x30] ss:$8 sps:$4 sm:$0xff]   ;;  %v775_v43 = vld [vmem:[#allocation7 + $0x44] ss:$8 sps:$4 sm:$0xff]  }
  0x55   :  { %672 = vmatprep.subr.bf16.mxu0 %v887_v0  ;;  %692 = vmatprep.subr.bf16.mxu1 %v887_v0  ;;  %v773_v44 = vld [vmem:[#allocation7 + $0x40] ss:$8 sps:$4 sm:$0xff]   ;;  %v778_v45 = vld [vmem:[#allocation7 + $0x54] ss:$8 sps:$4 sm:$0xff]   ;;  %v776_v46 = vld [vmem:[#allocation7 + $0x50] ss:$8 sps:$4 sm:$0xff]  }
  0x56   :  { %v781_v47 = vld [vmem:[#allocation7 + $0x64] ss:$8 sps:$4 sm:$0xff]   ;;  %v779_v48 = vld [vmem:[#allocation7 + $0x60] ss:$8 sps:$4 sm:$0xff]   ;;  %v784_v57 = vld [vmem:[#allocation7 + $0x74] ss:$8 sps:$4 sm:$0xff]  }
  0x57   :  { %v603_v49 = vld [vmem:[%s1063_s4] ss:$0 sm:$0xff]  ;;  %v782_v58 = vld [vmem:[#allocation7 + $0x70] ss:$8 sps:$4 sm:$0xff]  }
  0x58   :  { %673 = vmatpush3.bf16.msra.mxu0 %v740_v5  ;;  %693 = vmatpush3.bf16.msra.mxu1 %v748_v10  ;;  %v612_v60 = vld [vmem:[%s1065_s6] ss:$0 sm:$0xff]  ;;  %v448_v5 = vshrl.u32 %v447_v4, 7 }
  0x59   :  { %674 = vmatprep.subr.bf16.mxu0 %v887_v0  ;;  %694 = vmatprep.subr.bf16.mxu1 %v887_v0 }
  0x5a   :  { %v449_v6 = vsub.s32 0, %v448_v5  ;;  %v453_v8 = vsub.s32 1, %v448_v5 }
  0x5c   :  { %675 = vmatpush3.bf16.msra.mxu0 %v741_v7  ;;  %695 = vmatpush3.bf16.msra.mxu1 %v749_v12  ;;  %v445_v7 = vld [vmem:[%s1067_s8] sm:$0x3] }
  0x5d   :  { %676 = vmatprep.subr.bf16.mxu0 %v887_v0  ;;  %696 = vmatprep.subr.bf16.mxu1 %v887_v0  ;;  %v454_v10 = vrot.slane %v445_v7, %v453_v8 }
  0x60   :  { %677 = vmatpush3.bf16.msra.mxu0 %v742_v9  ;;  %697 = vmatpush3.bf16.msra.mxu1 %v750_v15  ;;  %v450_v9 = vrot.slane %v445_v7, %v449_v6 }
  0x61   :  { %678 = vmatprep.subr.bf16.mxu0 %v887_v0  ;;  %698 = vmatprep.subr.bf16.mxu1 %v887_v0 }
  0x64   :  { %679 = vmatpush3.bf16.msra.mxu0 %v743_v11  ;;  %699 = vmatpush3.bf16.msra.mxu1 %v751_v17 }
  0x65   :  { %680 = vmatprep.subr.bf16.mxu0 %v887_v0  ;;  %700 = vmatprep.subr.bf16.mxu1 %v887_v0 }
  0x68   :  { %681 = vmatpush3.bf16.msra.mxu0 %v744_v13  ;;  %701 = vmatpush3.bf16.msra.mxu1 %v752_v18 }
  0x69   :  { %706 = vmatprep.subr.bf16.mxu0 %v887_v0  ;;  %537 = vmatprep.subr.bf16.mxu1 %v763_v36 }
  0x6b   :  { %683 = vmatmul.mubr.bf16.vlgmr.msra.gmra.mrb[0].mxu0 %v89_v16 }
  0x6c   :  { %722 = vmatprep.mubr.msk.bf16.mxu0 %vm888_vm0, %v887_v0  ;;  %707 = vmatpush3.bf16.msra.mxu0 %v753_v19 }
  0x6d   :  { %708 = vmatprep.subr.bf16.mxu0 %v887_v0 }
  0x70   :  { %709 = vmatpush3.bf16.msra.mxu0 %v754_v20 }
  0x71   :  { %710 = vmatprep.subr.bf16.mxu0 %v887_v0 }
  0x74   :  { %711 = vmatpush3.bf16.msra.mxu0 %v755_v21 }
  0x75   :  { %712 = vmatprep.subr.bf16.mxu0 %v887_v0 }
  0x78   :  { %713 = vmatpush3.bf16.msra.mxu0 %v756_v22 }
  0x79   :  { %714 = vmatprep.subr.bf16.mxu0 %v887_v0 }
  0x7c   :  { %715 = vmatpush3.bf16.msra.mxu0 %v757_v23 }
  0x7d   :  { %716 = vmatprep.subr.bf16.mxu0 %v887_v0 }
  0x80   :  { %717 = vmatpush3.bf16.msra.mxu0 %v758_v24 }
  0x81   :  { %718 = vmatprep.subr.bf16.mxu0 %v887_v0 }
  0x84   :  { %719 = vmatpush3.bf16.msra.mxu0 %v759_v33 }
  0x85   :  { %720 = vmatprep.subr.bf16.mxu0 %v887_v0 }
  0x88   :  { %721 = vmatpush3.bf16.msra.mxu0 %v760_v34 }
 0x13e   :  { %v195_v26 = vpop.f32.mrb[0].mxu0 }
 0x13f   :  { %v196_v27 = vadd.f32 %v594_v25, %v195_v26  ;;  %v684_v28 = vpop.f32.mrb[1].mxu0 }
 0x140   :  { %v198_v29 = vpop.f32.mrb[2].mxu0 }
 0x141   :  { %v201_v30 = vmax.f32 %v196_v27, 0.0  ;;  %v685_v31 = vpop.f32.mrb[3].mxu0 }
 0x143   :  { %v202_v32 = vpack.c.bf16 %v201_v30, %v201_v30 }
 0x145   :  { %703 = vmatmul.mubr.bf16.vlgmr.msra.gmra.mrb[0].mxu1 %v202_v32 }
 0x146   :  { %538 = vmatpush1.bf16.msra.mxu1 %v761_v35  ;;  %569 = vmatprep.mubr.bf16.mxu1 %v889_v59 }
 0x147   :  { %539 = vmatprep.subr.bf16.mxu1 %v766_v37 }
 0x14a   :  { %540 = vmatpush1.bf16.msra.mxu1 %v764_v38 }
 0x14b   :  { %541 = vmatprep.subr.bf16.mxu1 %v769_v39 }
 0x14e   :  { %542 = vmatpush1.bf16.msra.mxu1 %v767_v40 }
 0x14f   :  { %543 = vmatprep.subr.bf16.mxu1 %v772_v41 }
 0x152   :  { %544 = vmatpush1.bf16.msra.mxu1 %v770_v42 }
 0x153   :  { %545 = vmatprep.subr.bf16.mxu1 %v775_v43 }
 0x156   :  { %546 = vmatpush1.bf16.msra.mxu1 %v773_v44 }
 0x157   :  { %547 = vmatprep.subr.bf16.mxu1 %v778_v45 }
 0x15a   :  { %548 = vmatpush1.bf16.msra.mxu1 %v776_v46 }
 0x15b   :  { %549 = vmatprep.subr.bf16.mxu1 %v781_v47 }
 0x15e   :  { %550 = vmatpush1.bf16.msra.mxu1 %v779_v48 }
 0x15f   :  { %551 = vmatprep.subr.bf16.mxu1 %v784_v57 }
 0x162   :  { %552 = vmatpush1.bf16.msra.mxu1 %v782_v58 }
 0x218   :  { %v308_v50 = vpop.f32.mrb[0].mxu1 }
 0x219   :  { %v309_v51 = vadd.f32 %v603_v49, %v308_v50  ;;  %v704_v52 = vpop.f32.mrb[1].mxu1 }
 0x21a   :  { %v311_v53 = vpop.f32.mrb[2].mxu1 }
 0x21b   :  { %v314_v54 = vmax.f32 %v309_v51, 0.0  ;;  %v705_v55 = vpop.f32.mrb[3].mxu1 }
 0x21d   :  { %v315_v56 = vpack.c.bf16 %v314_v54, %v314_v54 }
 0x21f   :  { %723 = vmatmul.mubr.bf16.vlgmr.msra.gmra.mrb[4].mxu0 %v315_v56 }
 0x2f2   :  { %v421_v61 = vpop.f32.mrb[4].mxu0 }
 0x2f3   :  { %v422_v62 = vadd.f32 %v612_v60, %v421_v61  ;;  %v724_v63 = vpop.f32.mrb[5].mxu0 }
 0x2f4   :  { %v424_v0 = vpop.f32.mrb[6].mxu0 }
 0x2f5   :  { %v427_v1 = vmax.f32 %v422_v62, 0.0  ;;  %v725_v2 = vpop.f32.mrb[7].mxu0 }
 0x2f7   :  { %v428_v3 = vpack.c.bf16 %v427_v1, %v427_v1 }
 0x2f9   :  { %570 = vmatmul.mubr.bf16.vlgmr.msra.gmra.mrb[4].mxu1 %v428_v3 }
 0x3cc   :  { %v571_v11 = vpop.f32.mrb[4].mxu1 }
 0x3cd   :  { %v572_v12 = vadd.f32 %v571_v11, %v450_v9  ;;  %v573_v13 = vpop.f32.mrb[5].mxu1 }
 0x3ce   :  { %v574_v14 = vadd.f32 %v573_v13, %v454_v10  ;;  %v575_v15 = vpop.f32.mrb[6].mxu1 }
 0x3cf   :  { %v576_v16 = vpop.f32.mrb[7].mxu1 }
 0x3d0   :  { %v638_v17 = vpack.c.bf16 %v574_v14, %v572_v12 }
 0x3d2   :  { %586 = vst [vmem:[%s1068_s9] sm:$0xff] %v638_v17 }
 0x3d3   :  { %591 = vsyncpa [#allocation3], 1 }
 0x3d4   :  { %592 = vsyncpa [#allocation5], 1 }
 0x3d5   :  { %593 = vsyncpa [#allocation8], 1 }

</bundles_post_ra>
